<compile_context>
chip_gen: v7x
topology: tpu7x:2x2x1
jax: 0.10.0
libtpu: 0.0.40
codegen_flags: <defaults>
</compile_context>

<pallas_src>
import functools

import jax
import jax.numpy as jnp
from jax.experimental import pallas as pl
from jax.experimental.pallas import tpu as pltpu


LAYER_DIMS = [140, 100, 70, 40, 70, 100, 140]
D_IN = LAYER_DIMS[0]      # 140: input width, fed unpadded (full last dim)
D_OUT = LAYER_DIMS[-1]    # 140: output width, stored unpadded
HID = 128                 # lane width for every hidden layer (100/70/70/100 -> 128)
OUT_PAD = 256             # lane-dense width of the final matmul (140 -> 256)
NUM_FUSED_LAYERS = 5      # 6 linear layers with the activation-free 3&4 pair folded


def _round_up(x, m):
    return (x + m - 1) // m * m


def _encoder_decoder_kernel(x_ref, w_in_ref, w_mid_ref, w_out_ref,
                            b_mid_ref, b_out_ref, o_ref):
    """Fused 5-matmul MLP on one (tb, 140) activation tile.

    x_ref:     (tb, 140)       activation tile (streamed over the batch grid)
    w_in_ref:  (140, 128)      layer-0 weight, out-dim 100 zero-padded to 128
    w_mid_ref: (3, 128, 128)   layers 1..3 weights, zero-padded
    w_out_ref: (128, 256)      layer-4 weight, 100->140 zero-padded to 128->256
    b_mid_ref: (4, 1, 128)     biases for layers 0..3, zero-padded
    b_out_ref: (1, 256)        layer-4 bias, zero-padded
    o_ref:     (tb, 140)       output tile
    """
    # Layer 0: 140 -> 128 (=100 padded), tanh.  K = 140 (full last dim of x).
    h = jnp.tanh(
        jnp.dot(x_ref[...], w_in_ref[...], preferred_element_type=jnp.float32)
        + b_mid_ref[0]
    )
    # Layers 1..3: 128 -> 128 (hidden widths 70/70/100 zero-padded), tanh.
    # Zero padding stays exactly zero through every layer (tanh(0) == 0).
    for i in range(3):
        h = jnp.tanh(
            jnp.dot(h, w_mid_ref[i], preferred_element_type=jnp.float32)
            + b_mid_ref[i + 1]
        )
    # Layer 4: 128 -> 256 lane-dense matmul, no activation; only the first 140
    # output lanes are valid and only those are stored.
    y = (jnp.dot(h, w_out_ref[...], preferred_element_type=jnp.float32)
         + b_out_ref[...])
    o_ref[...] = y[:, :D_OUT].astype(o_ref.dtype)


def init_params(key):
    """PyTorch nn.Linear-style uniform init. Weights stored as (in, out); biases (1, out)."""
    params = []
    dims = LAYER_DIMS
    for i in range(len(dims) - 1):
        fan_in, fan_out = dims[i], dims[i + 1]
        key, kw, kb = jax.random.split(key, 3)
        bound = 1.0 / jnp.sqrt(fan_in)
        w = jax.random.uniform(kw, (fan_in, fan_out), jnp.float32, -bound, bound)
        b = jax.random.uniform(kb, (1, fan_out), jnp.float32, -bound, bound)
        params.append((w, b))
    return params


def pack_params(params):
    """Pack the 6 (W, b) pairs into 5 tightly zero-padded kernel operands.

    - Fuses layers 3 & 4 (70->40, 40->70, no activation in between):
        W34 = W3 @ W4,  b34 = b3 @ W4 + b4   (exact in real arithmetic)
    - Pads hidden dims to 128 lanes, the final output matmul to 256 lanes.
    """
    (w1, b1), (w2, b2), (w3, b3), (w4, b4), (w5, b5), (w6, b6) = params
    w34 = w3 @ w4
    b34 = b3 @ w4 + b4
    fused = [(w1, b1), (w2, b2), (w34, b34), (w5, b5), (w6, b6)]

    f32 = jnp.float32
    w_in = jnp.zeros((D_IN, HID), f32).at[:, : w1.shape[1]].set(w1.astype(f32))

    w_mid = jnp.zeros((3, HID, HID), f32)
    for i, (w, _) in enumerate(fused[1:4]):
        w_mid = w_mid.at[i, : w.shape[0], : w.shape[1]].set(w.astype(f32))

    b_mid = jnp.zeros((4, 1, HID), f32)
    for i, (_, b) in enumerate(fused[:4]):
        b_mid = b_mid.at[i, :, : b.shape[1]].set(b.astype(f32))

    w_out = jnp.zeros((HID, OUT_PAD), f32)
    w_out = w_out.at[: w6.shape[0], : w6.shape[1]].set(w6.astype(f32))
    b_out = jnp.zeros((1, OUT_PAD), f32).at[:, : b6.shape[1]].set(b6.astype(f32))

    return w_in, w_mid, w_out, b_mid, b_out


@functools.partial(jax.jit, static_argnames=("block_b",))
def encoder_decoder_forward(x, w_in, w_mid, w_out, b_mid, b_out, block_b=512):
    """x: (B, 140) -> (B, 140), float32.

    block_b: maximum batch-tile rows per grid step (multiple of 8; tb is also
    capped so the grid has at least 2 steps whenever B >= 16, for v7x megacore).
    """
    B, f_in = x.shape
    assert f_in == D_IN, f"expected {D_IN} input features, got {f_in}"

    # Batch tile: multiple of 8 sublanes; aim for >= 2 grid steps when possible.
    b8 = _round_up(B, 8)
    half = _round_up(b8 // 2, 8) if b8 >= 16 else b8
    tb = min(block_b, half)
    b_pad = _round_up(B, tb)

    x = x.astype(jnp.float32)
    if b_pad != B:
        # Pad only the batch dim; the 140-lane feature dim is fed unpadded,
        # so there is no wrapper-side lane-pad copy of the input in HBM.
        x = jnp.pad(x, ((0, b_pad - B), (0, 0)))

    param_bytes = 4 * (D_IN * HID + 3 * HID * HID + HID * OUT_PAD
                       + 4 * HID + OUT_PAD)
    cost = pl.CostEstimate(
        flops=2 * b_pad * (D_IN * HID + 3 * HID * HID + HID * OUT_PAD),
        transcendentals=b_pad * 4 * HID,
        bytes_accessed=4 * b_pad * (D_IN + D_OUT) + param_bytes,
    )

    out = pl.pallas_call(
        _encoder_decoder_kernel,
        out_shape=jax.ShapeDtypeStruct((b_pad, D_OUT), jnp.float32),
        grid_spec=pltpu.PrefetchScalarGridSpec(
            num_scalar_prefetch=0,
            grid=(b_pad // tb,),
            in_specs=[
                # activations: streamed over the batch grid (auto double-buffered)
                pl.BlockSpec((tb, D_IN), lambda i: (i, 0)),
                # parameters: constant block index -> fetched once, VMEM-resident
                pl.BlockSpec((D_IN, HID), lambda i: (0, 0)),
                pl.BlockSpec((3, HID, HID), lambda i: (0, 0, 0)),
                pl.BlockSpec((HID, OUT_PAD), lambda i: (0, 0)),
                pl.BlockSpec((4, 1, HID), lambda i: (0, 0, 0)),
                pl.BlockSpec((1, OUT_PAD), lambda i: (0, 0)),
            ],
            out_specs=pl.BlockSpec((tb, D_OUT), lambda i: (i, 0)),
        ),
        compiler_params=pltpu.CompilerParams(
            dimension_semantics=("parallel",)  # shard batch tiles across v7x's 2 TCs
        ),
        cost_estimate=cost,
    )(x, w_in, w_mid, w_out, b_mid, b_out)

    return out if b_pad == B else out[:B]


def _reference_forward(x, params):
    """Pure-JAX f32 reference (unfused, unpadded)."""
    h = x.astype(jnp.float32)
    for i, (w, b) in enumerate(params):
        h = h @ w + b
        if i not in (2, 5):  # no tanh after the latent (encoder-out) or final layer
            h = jnp.tanh(h)
    return h


if __name__ == "__main__":
    key = jax.random.PRNGKey(0)
    key, kx = jax.random.split(key)

    params = init_params(key)
    packed = pack_params(params)

    # Small demo batch (single grid step).
    B = 8
    x = jax.random.normal(kx, (B, 140), dtype=jnp.float32)
    out = jax.block_until_ready(encoder_decoder_forward(x, *packed))
    ref = jax.block_until_ready(_reference_forward(x, params))
    assert out.shape == (B, 140)
    assert jnp.allclose(out, ref, atol=1e-4, rtol=1e-4), "mismatch vs reference (B=8)"

    # Exercise the batched, pipelined, batch-padded multi-tile grid path.
    B2 = 300
    x2 = jax.random.normal(jax.random.PRNGKey(1), (B2, 140), dtype=jnp.float32)
    out2 = jax.block_until_ready(
        encoder_decoder_forward(x2, *packed, block_b=512)
    )
    ref2 = jax.block_until_ready(_reference_forward(x2, params))
    assert out2.shape == (B2, 140)
    assert jnp.allclose(out2, ref2, atol=1e-4, rtol=1e-4), "mismatch vs reference (B=300)"

    print("KERNEL_OK")
</pallas_src>

<mosaic_0001>
module attributes {stable_mosaic.version = 11 : i64} {
  func.func @_encoder_decoder_kernel(%arg0: i32, %arg1: memref<8x140xf32, #tpu.memory_space<vmem>>, %arg2: memref<140x128xf32, #tpu.memory_space<vmem>>, %arg3: memref<3x128x128xf32, #tpu.memory_space<vmem>>, %arg4: memref<128x256xf32, #tpu.memory_space<vmem>>, %arg5: memref<4x1x128xf32, #tpu.memory_space<vmem>>, %arg6: memref<1x256xf32, #tpu.memory_space<vmem>>, %arg7: memref<8x140xf32, #tpu.memory_space<vmem>>) attributes {dimension_semantics = [#tpu.dimension_semantics<parallel>], iteration_bounds = array<i64: 1>, scalar_prefetch = 0 : i64, scratch_operands = 0 : i64, tpu.core_type = #tpu.core_type<tc>, window_params = [{transform_indices = @transform_0, window_bounds = array<i64: 8, 140>}, {pipeline_mode = #tpu.pipeline_mode<synchronous>, transform_indices = @transform_1, window_bounds = array<i64: 140, 128>}, {pipeline_mode = #tpu.pipeline_mode<synchronous>, transform_indices = @transform_2, window_bounds = array<i64: 3, 128, 128>}, {pipeline_mode = #tpu.pipeline_mode<synchronous>, transform_indices = @transform_3, window_bounds = array<i64: 128, 256>}, {pipeline_mode = #tpu.pipeline_mode<synchronous>, transform_indices = @transform_4, window_bounds = array<i64: 4, 1, 128>}, {pipeline_mode = #tpu.pipeline_mode<synchronous>, transform_indices = @transform_5, window_bounds = array<i64: 1, 256>}, {transform_indices = @transform_6, window_bounds = array<i64: 8, 140>}]} {
    %c0 = arith.constant 0 : index
    %c0_0 = arith.constant 0 : index
    %0 = vector.load %arg1[%c0, %c0_0] : memref<8x140xf32, #tpu.memory_space<vmem>>, vector<8x140xf32>
    %c0_1 = arith.constant 0 : index
    %c0_2 = arith.constant 0 : index
    %1 = vector.load %arg2[%c0_1, %c0_2] : memref<140x128xf32, #tpu.memory_space<vmem>>, vector<140x128xf32>
    %cst = arith.constant dense<0.000000e+00> : vector<8x128xf32>
    %2 = tpu.matmul %0, %1, %cst {dimension_numbers = #tpu.dot_dimension_numbers<[1], [0], [0], [1], [0, 0, 1, 1], [], []>} : vector<8x140xf32>, vector<140x128xf32>, vector<8x128xf32> -> vector<8x128xf32>
    %c0_3 = arith.constant 0 : index
    %c0_4 = arith.constant 0 : index
    %c0_5 = arith.constant 0 : index
    %3 = vector.load %arg5[%c0_3, %c0_4, %c0_5] : memref<4x1x128xf32, #tpu.memory_space<vmem>>, vector<1x1x128xf32>
    %4 = vector.shape_cast %3 : vector<1x1x128xf32> to vector<1x128xf32>
    %5 = vector.broadcast %4 : vector<1x128xf32> to vector<8x128xf32>
    %6 = arith.addf %2, %5 : vector<8x128xf32>
    %7 = math.tanh %6 : vector<8x128xf32>
    %c0_6 = arith.constant 0 : index
    %c0_7 = arith.constant 0 : index
    %c0_8 = arith.constant 0 : index
    %8 = vector.load %arg3[%c0_6, %c0_7, %c0_8] : memref<3x128x128xf32, #tpu.memory_space<vmem>>, vector<1x128x128xf32>
    %9 = vector.shape_cast %8 : vector<1x128x128xf32> to vector<128x128xf32>
    %cst_9 = arith.constant dense<0.000000e+00> : vector<8x128xf32>
    %10 = tpu.matmul %7, %9, %cst_9 {dimension_numbers = #tpu.dot_dimension_numbers<[1], [0], [0], [1], [0, 0, 1, 1], [], []>} : vector<8x128xf32>, vector<128x128xf32>, vector<8x128xf32> -> vector<8x128xf32>
    %c1 = arith.constant 1 : index
    %c0_10 = arith.constant 0 : index
    %c0_11 = arith.constant 0 : index
    %11 = vector.load %arg5[%c1, %c0_10, %c0_11] : memref<4x1x128xf32, #tpu.memory_space<vmem>>, vector<1x1x128xf32>
    %12 = vector.shape_cast %11 : vector<1x1x128xf32> to vector<1x128xf32>
    %13 = vector.broadcast %12 : vector<1x128xf32> to vector<8x128xf32>
    %14 = arith.addf %10, %13 : vector<8x128xf32>
    %15 = math.tanh %14 : vector<8x128xf32>
    %c1_12 = arith.constant 1 : index
    %c0_13 = arith.constant 0 : index
    %c0_14 = arith.constant 0 : index
    %16 = vector.load %arg3[%c1_12, %c0_13, %c0_14] : memref<3x128x128xf32, #tpu.memory_space<vmem>>, vector<1x128x128xf32>
    %17 = vector.shape_cast %16 : vector<1x128x128xf32> to vector<128x128xf32>
    %cst_15 = arith.constant dense<0.000000e+00> : vector<8x128xf32>
    %18 = tpu.matmul %15, %17, %cst_15 {dimension_numbers = #tpu.dot_dimension_numbers<[1], [0], [0], [1], [0, 0, 1, 1], [], []>} : vector<8x128xf32>, vector<128x128xf32>, vector<8x128xf32> -> vector<8x128xf32>
    %c2 = arith.constant 2 : index
    %c0_16 = arith.constant 0 : index
    %c0_17 = arith.constant 0 : index
    %19 = vector.load %arg5[%c2, %c0_16, %c0_17] : memref<4x1x128xf32, #tpu.memory_space<vmem>>, vector<1x1x128xf32>
    %20 = vector.shape_cast %19 : vector<1x1x128xf32> to vector<1x128xf32>
    %21 = vector.broadcast %20 : vector<1x128xf32> to vector<8x128xf32>
    %22 = arith.addf %18, %21 : vector<8x128xf32>
    %23 = math.tanh %22 : vector<8x128xf32>
    %c2_18 = arith.constant 2 : index
    %c0_19 = arith.constant 0 : index
    %c0_20 = arith.constant 0 : index
    %24 = vector.load %arg3[%c2_18, %c0_19, %c0_20] : memref<3x128x128xf32, #tpu.memory_space<vmem>>, vector<1x128x128xf32>
    %25 = vector.shape_cast %24 : vector<1x128x128xf32> to vector<128x128xf32>
    %cst_21 = arith.constant dense<0.000000e+00> : vector<8x128xf32>
    %26 = tpu.matmul %23, %25, %cst_21 {dimension_numbers = #tpu.dot_dimension_numbers<[1], [0], [0], [1], [0, 0, 1, 1], [], []>} : vector<8x128xf32>, vector<128x128xf32>, vector<8x128xf32> -> vector<8x128xf32>
    %c3 = arith.constant 3 : index
    %c0_22 = arith.constant 0 : index
    %c0_23 = arith.constant 0 : index
    %27 = vector.load %arg5[%c3, %c0_22, %c0_23] : memref<4x1x128xf32, #tpu.memory_space<vmem>>, vector<1x1x128xf32>
    %28 = vector.shape_cast %27 : vector<1x1x128xf32> to vector<1x128xf32>
    %29 = vector.broadcast %28 : vector<1x128xf32> to vector<8x128xf32>
    %30 = arith.addf %26, %29 : vector<8x128xf32>
    %31 = math.tanh %30 : vector<8x128xf32>
    %c0_24 = arith.constant 0 : index
    %c0_25 = arith.constant 0 : index
    %32 = vector.load %arg4[%c0_24, %c0_25] : memref<128x256xf32, #tpu.memory_space<vmem>>, vector<128x256xf32>
    %cst_26 = arith.constant dense<0.000000e+00> : vector<8x256xf32>
    %33 = tpu.matmul %31, %32, %cst_26 {dimension_numbers = #tpu.dot_dimension_numbers<[1], [0], [0], [1], [0, 0, 1, 1], [], []>} : vector<8x128xf32>, vector<128x256xf32>, vector<8x256xf32> -> vector<8x256xf32>
    %c0_27 = arith.constant 0 : index
    %c0_28 = arith.constant 0 : index
    %34 = vector.load %arg6[%c0_27, %c0_28] : memref<1x256xf32, #tpu.memory_space<vmem>>, vector<1x256xf32>
    %35 = vector.broadcast %34 : vector<1x256xf32> to vector<8x256xf32>
    %36 = arith.addf %33, %35 : vector<8x256xf32>
    %37 = vector.extract_strided_slice %36 {offsets = [0, 0], sizes = [8, 140], strides = [1, 1]} : vector<8x256xf32> to vector<8x140xf32>
    %c0_29 = arith.constant 0 : index
    %c0_30 = arith.constant 0 : index
    %38 = vector.load %arg7[%c0_29, %c0_30] : memref<8x140xf32, #tpu.memory_space<vmem>>, vector<8x140xf32>
    tpu.vector_store %arg7[%c0_29, %c0_30], %37 {strides = array<i32>} : memref<8x140xf32, #tpu.memory_space<vmem>>, vector<8x140xf32>,
    return
  }
  func.func @transform_0(%arg0: i32) -> (i32, i32) {
    %c0_i32 = arith.constant 0 : i32
    %c0_i32_0 = arith.constant 0 : i32
    return %arg0, %c0_i32 : i32, i32
  }
  func.func @transform_1(%arg0: i32) -> (i32, i32) {
    %c0_i32 = arith.constant 0 : i32
    %c0_i32_0 = arith.constant 0 : i32
    %c0_i32_1 = arith.constant 0 : i32
    return %c0_i32, %c0_i32_0 : i32, i32
  }
  func.func @transform_2(%arg0: i32) -> (i32, i32, i32) {
    %c0_i32 = arith.constant 0 : i32
    %c0_i32_0 = arith.constant 0 : i32
    %c0_i32_1 = arith.constant 0 : i32
    %c0_i32_2 = arith.constant 0 : i32
    return %c0_i32, %c0_i32_0, %c0_i32_1 : i32, i32, i32
  }
  func.func @transform_3(%arg0: i32) -> (i32, i32) {
    %c0_i32 = arith.constant 0 : i32
    %c0_i32_0 = arith.constant 0 : i32
    %c0_i32_1 = arith.constant 0 : i32
    return %c0_i32, %c0_i32_0 : i32, i32
  }
  func.func @transform_4(%arg0: i32) -> (i32, i32, i32) {
    %c0_i32 = arith.constant 0 : i32
    %c0_i32_0 = arith.constant 0 : i32
    %c0_i32_1 = arith.constant 0 : i32
    %c0_i32_2 = arith.constant 0 : i32
    return %c0_i32, %c0_i32_0, %c0_i32_1 : i32, i32, i32
  }
  func.func @transform_5(%arg0: i32) -> (i32, i32) {
    %c0_i32 = arith.constant 0 : i32
    %c0_i32_0 = arith.constant 0 : i32
    %c0_i32_1 = arith.constant 0 : i32
    return %c0_i32, %c0_i32_0 : i32, i32
  }
  func.func @transform_6(%arg0: i32) -> (i32, i32) {
    %c0_i32 = arith.constant 0 : i32
    %c0_i32_0 = arith.constant 0 : i32
    return %arg0, %c0_i32 : i32, i32
  }
}

</mosaic_0001>

<bundles_post_ra>
// kernel: encoder_decoder_forward.1
= control target key start
LH: loop header
LB: loop body
LE: loop exit
PB: predicated region body
PF: predicated region fallthrough
CT: control target
= control target key end

     0   :  { %11 = vsyncpa [#allocation3], 0  ;;  %s1211_s0 = inlined_call_operand.hbm [shape: f32[8,140], index: 0, kind: input, shape index: {}]   ;;  %s1212_s1 = inlined_call_operand.hbm [shape: f32[140,128], index: 1, kind: input, shape index: {}]   ;;  %s1213_s2 = inlined_call_operand.hbm [shape: f32[3,128,128], index: 2, kind: input, shape index: {}]   ;;  %s1214_s3 = inlined_call_operand.hbm [shape: f32[128,256], index: 3, kind: input, shape index: {}]   ;;  %s1215_s4 = inlined_call_operand.vmem [shape: f32[4,1,128], index: 4, kind: input, shape index: {}]   ;;  %s1216_s5 = inlined_call_operand.vmem [shape: f32[1,256], index: 5, kind: input, shape index: {}]   ;;  %s1217_s6 = inlined_call_operand.hbm [shape: f32[8,140], index: 6, kind: output, shape index: {}]  }
   0x1   :  { %12 = vsyncpa [#allocation6], 0 }
   0x2   :  { %13 = vsyncpa [#allocation9], 0 }
   0x3   :  { %14 = vsyncpa [#allocation4], 0  ;;  %s1040_s21 = smov [#allocation5]   ;;  %s922_s25 = scalar_lea.hbm %s1212_s1, 2304 }
   0x4   :  { %s30_s22 = sshll.u32 %s1040_s21, 4  ;;  %p923_p0 = scmp.ne.s32.totalorder %s1212_s1, %s922_s25  ;;  %s31_s22 = int_to_ptr.vmem [resolvable:$true] %s30_s22 }
   0x5   :  { %p926_p1 = scmp.lt.u32.totalorder %s922_s25, %s1212_s1 }
   0x7   :  { %p928_p2 = pnand %p926_p1, %p923_p0 }
   0x9   :  { %931 = shalt.err (!%p928_p2)
}
   0xa   :  { %s932_s30 = scalar_lea.vmem %s31_s22, 2304  ;;  %p937_p4 = scmp.lt.s32.totalorder %s31_s22, %s31_s22 }
   0xb   :  { %p933_p3 = scmp.ne.s32.totalorder %s31_s22, %s932_s30  ;;  %p938_p5 = scmp.lt.s32.totalorder %s932_s30, %s932_s30 }
   0xd   :  { %p939_p6 = por %p938_p5, %p937_p4 }
   0xf   :  { %p940_p7 = pnand %p939_p6, %p933_p3 }
  0x11   :  { %943 = shalt.err (!%p940_p7)
}
  0x12   :  { %s1041_s7 = smov 128   ;;  %s1042_s8 = smov 8  }
  0x13   :  { %36 = dma.hbm_to_vmem [thread:$0]  %s1212_s1, 2304, %s31_s22, [#allocation6], %s1041_s7, %s1041_s7, %s1042_s8  }
  0x14   :  { %s1043_s11 = smov [#allocation2]   ;;  %s1044_s13 = smov [#allocation7]  }
  0x15   :  { %s21_s12 = sshll.u32 %s1043_s11, 4  ;;  %s42_s14 = sshll.u32 %s1044_s13, 4  ;;  %s22_s12 = int_to_ptr.vmem [resolvable:$true] %s21_s12  ;;  %s43_s14 = int_to_ptr.vmem [resolvable:$true] %s42_s14 }
  0x16   :  { %s944_s17 = scalar_lea.hbm %s1211_s0, 256 }
  0x17   :  { %p945_p8 = scmp.ne.s32.totalorder %s1211_s0, %s944_s17  ;;  %p948_p9 = scmp.lt.u32.totalorder %s944_s17, %s1211_s0 }
  0x19   :  { %p950_p10 = pnand %p948_p9, %p945_p8 }
  0x1b   :  { %953 = shalt.err (!%p950_p10)
}
  0x1c   :  { %s954_s1 = scalar_lea.vmem %s22_s12, 256  ;;  %p959_p12 = scmp.lt.s32.totalorder %s22_s12, %s22_s12 }
  0x1d   :  { %p955_p11 = scmp.ne.s32.totalorder %s22_s12, %s954_s1  ;;  %p960_p13 = scmp.lt.s32.totalorder %s954_s1, %s954_s1 }
  0x1f   :  { %p961_p0 = por %p960_p13, %p959_p12 }
  0x21   :  { %p962_p1 = pnand %p961_p0, %p955_p11 }
  0x23   :  { %965 = shalt.err (!%p962_p1)
}
  0x24   :  { %24 = dma.hbm_to_vmem [thread:$0]  %s1211_s0, 256, %s22_s12, [#allocation3]  }
  0x25   :  { %s966_s26 = scalar_lea.hbm %s1213_s2, 6144 }
  0x26   :  { %p967_p2 = scmp.ne.s32.totalorder %s1213_s2, %s966_s26  ;;  %p970_p3 = scmp.lt.u32.totalorder %s966_s26, %s1213_s2 }
  0x28   :  { %p972_p4 = pnand %p970_p3, %p967_p2 }
  0x2a   :  { %975 = shalt.err (!%p972_p4)
}
  0x2b   :  { %s976_s9 = scalar_lea.vmem %s43_s14, 6144  ;;  %p981_p6 = scmp.lt.s32.totalorder %s43_s14, %s43_s14 }
  0x2c   :  { %p977_p5 = scmp.ne.s32.totalorder %s43_s14, %s976_s9  ;;  %p982_p7 = scmp.lt.s32.totalorder %s976_s9, %s976_s9 }
  0x2e   :  { %p983_p8 = por %p982_p7, %p981_p6 }
  0x30   :  { %p984_p9 = pnand %p983_p8, %p977_p5 }
  0x32   :  { %987 = shalt.err (!%p984_p9)
}
  0x33   :  { %48 = dma.hbm_to_vmem [thread:$0]  %s1213_s2, 6144, %s43_s14, [#allocation6], %s1041_s7, %s1041_s7, %s1042_s8  }
  0x34   :  { %s1045_s11 = smov [#allocation8]   ;;  %s988_s16 = scalar_lea.hbm %s1214_s3, 4096 }
  0x35   :  { %s54_s12 = sshll.u32 %s1045_s11, 4  ;;  %p989_p10 = scmp.ne.s32.totalorder %s1214_s3, %s988_s16  ;;  %s55_s12 = int_to_ptr.vmem [resolvable:$true] %s54_s12 }
  0x36   :  { %p992_p11 = scmp.lt.u32.totalorder %s988_s16, %s1214_s3 }
  0x38   :  { %p994_p12 = pnand %p992_p11, %p989_p10 }
  0x3a   :  { %997 = shalt.err (!%p994_p12)
}
  0x3b   :  { %s998_s21 = scalar_lea.vmem %s55_s12, 4096  ;;  %p1003_p0 = scmp.lt.s32.totalorder %s55_s12, %s55_s12 }
  0x3c   :  { %p999_p13 = scmp.ne.s32.totalorder %s55_s12, %s998_s21  ;;  %p1004_p1 = scmp.lt.s32.totalorder %s998_s21, %s998_s21 }
  0x3e   :  { %p1005_p2 = por %p1004_p1, %p1003_p0 }
  0x40   :  { %p1006_p3 = pnand %p1005_p2, %p999_p13 }
  0x42   :  { %1009 = shalt.err (!%p1006_p3)
}
  0x43   :  { %s1046_s2 = smov 256   ;;  %s1047_s7 = smov 16  }
  0x44   :  { %60 = dma.hbm_to_vmem [thread:$0]  %s1214_s3, 4096, %s55_s12, [#allocation9], %s1046_s2, %s1046_s2, %s1047_s7  }
  0x45   :  { %1032 = dma.done.wait [#allocation3], 256  }
  0x46   :  { %1033 = vsyncadd [#allocation3], 4294967040 }
  0x47   :  { %1034 = dma.done.wait [#allocation6], 8448  }
  0x48   :  { %1035 = vsyncadd [#allocation6], 4294958848 }
  0x49   :  { %1036 = dma.done.wait [#allocation9], 4096  }
  0x4a   :  { %1037 = vsyncadd [#allocation9], 4294963200  ;;  %v1048_v0 = vmov 0.0|0.0   ;;  %v79_v1 = vld [vmem:[#allocation5] sm:$0xff]  ;;  %v80_v2 = vld [vmem:[#allocation5 + $0x8] sm:$0xff]  ;;  %vm104_vm0 = vcmask 97280  }
  0x4b   :  { %769 = vmatprep.subr.bf16.mxu0 %v1048_v0  ;;  %797 = vmatprep.subr.bf16.mxu1 %v1048_v0  ;;  %v81_v3 = vld [vmem:[#allocation5 + $0x10] sm:$0xff]  ;;  %v770_v4 = vpack.c.bf16 %v80_v2, %v79_v1  ;;  %v82_v5 = vld [vmem:[#allocation5 + $0x18] sm:$0xff]  ;;  %v83_v7 = vld [vmem:[#allocation5 + $0x20] sm:$0xff]  ;;  %vm108_vm1 = vcmask 1043456   ;;  %vm1049_vm2 = vmmov 1   ;;  %vm1050_vm4 = vmmov 0  }
  0x4c   :  { %v773_v6 = vpack.c.bf16 %v82_v5, %v81_v3  ;;  %v84_v8 = vld [vmem:[#allocation5 + $0x28] sm:$0xff]  ;;  %v78_v9 = vld [vmem:[#allocation2 + $0x8] sm:$0xff]  ;;  %v183_v10 = vld [vmem:[#allocation7] sm:$0xff]  ;;  %v1051_v53 = vmov 0.0   ;;  %s1052_s30 = smov [#allocation10]  }
  0x4d   :  { %771 = vmatpush1.bf16.msra.mxu0 %v770_v4  ;;  %v776_v11 = vpack.c.bf16 %v84_v8, %v83_v7  ;;  %606 = vmatprep.mubr.msk.f32.mxu0 %vm104_vm0, %v78_v9  ;;  %v184_v12 = vld [vmem:[#allocation7 + $0x8] sm:$0xff]  ;;  %v185_v13 = vld [vmem:[#allocation7 + $0x10] sm:$0xff]  ;;  %v186_v14 = vld [vmem:[#allocation7 + $0x18] sm:$0xff]  ;;  %s593_s9 = sshll.u32 %s1052_s30, 4  ;;  %s594_s9 = int_to_ptr.vmem [resolvable:$true] %s593_s9 }
  0x4e   :  { %772 = vmatprep.subr.bf16.mxu0 %v1048_v0  ;;  %v85_v15 = vld [vmem:[#allocation5 + $0x30] sm:$0xff]  ;;  %v86_v16 = vld [vmem:[#allocation5 + $0x38] sm:$0xff]  ;;  %v798_v17 = vpack.c.bf16 %v184_v12, %v183_v10  ;;  %v801_v18 = vpack.c.bf16 %v186_v14, %v185_v13  ;;  %v87_v22 = vld [vmem:[#allocation5 + $0x40] sm:$0xff]  ;;  %696 = vmatprep.mubr.msk.f32.mxu1 %vm1050_vm4, %v1051_v53  ;;  %p1015_p5 = scmp.lt.s32.totalorder %s594_s9, %s594_s9 }
  0x4f   :  { %v779_v19 = vpack.c.bf16 %v86_v16, %v85_v15  ;;  %v187_v20 = vld [vmem:[#allocation7 + $0x20] sm:$0xff]  ;;  %v188_v21 = vld [vmem:[#allocation7 + $0x28] sm:$0xff]  ;;  %v88_v23 = vld [vmem:[#allocation5 + $0x48] sm:$0xff] }
  0x50   :  { %799 = vmatpush3.bf16.msra.mxu1 %v798_v17  ;;  %v804_v24 = vpack.c.bf16 %v188_v21, %v187_v20  ;;  %v782_v25 = vpack.c.bf16 %v88_v23, %v87_v22  ;;  %v189_v26 = vld [vmem:[#allocation7 + $0x30] sm:$0xff]  ;;  %v190_v27 = vld [vmem:[#allocation7 + $0x38] sm:$0xff]  ;;  %v89_v28 = vld [vmem:[#allocation5 + $0x50] sm:$0xff] }
  0x51   :  { %774 = vmatpush1.bf16.msra.mxu0 %v773_v6  ;;  %800 = vmatprep.subr.bf16.mxu1 %v1048_v0  ;;  %v90_v29 = vld [vmem:[#allocation5 + $0x58] sm:$0xff]  ;;  %v807_v30 = vpack.c.bf16 %v190_v27, %v189_v26  ;;  %v191_v32 = vld [vmem:[#allocation7 + $0x40] sm:$0xff]  ;;  %v91_v34 = vld [vmem:[#allocation5 + $0x60] sm:$0xff] }
  0x52   :  { %775 = vmatprep.subr.bf16.mxu0 %v1048_v0  ;;  %v785_v31 = vpack.c.bf16 %v90_v29, %v89_v28  ;;  %v192_v33 = vld [vmem:[#allocation7 + $0x48] sm:$0xff]  ;;  %v92_v35 = vld [vmem:[#allocation5 + $0x68] sm:$0xff]  ;;  %v93_v38 = vld [vmem:[#allocation5 + $0x70] sm:$0xff] }
  0x53   :  { %v810_v36 = vpack.c.bf16 %v192_v33, %v191_v32  ;;  %v788_v37 = vpack.c.bf16 %v92_v35, %v91_v34  ;;  %v94_v39 = vld [vmem:[#allocation5 + $0x78] sm:$0xff]  ;;  %v95_v41 = vld [vmem:[#allocation5 + $0x80] sm:$0xff]  ;;  %v96_v42 = vld [vmem:[#allocation5 + $0x88] sm:$0xf] }
  0x54   :  { %802 = vmatpush3.bf16.msra.mxu1 %v801_v18  ;;  %v791_v40 = vpack.c.bf16 %v94_v39, %v93_v38  ;;  %v794_v43 = vpack.c.bf16 %v96_v42, %v95_v41  ;;  %vm795_vm3 = vmpackc.low %vm108_vm1, %vm1049_vm2  ;;  %v77_v44 = vld [vmem:[#allocation2] sm:$0xff]  ;;  %v193_v45 = vld [vmem:[#allocation7 + $0x50] sm:$0xff] }
  0x55   :  { %777 = vmatpush1.bf16.msra.mxu0 %v776_v11  ;;  %803 = vmatprep.subr.bf16.mxu1 %v1048_v0  ;;  %v194_v46 = vld [vmem:[#allocation7 + $0x58] sm:$0xff]  ;;  %v195_v48 = vld [vmem:[#allocation7 + $0x60] sm:$0xff]  ;;  %v196_v49 = vld [vmem:[#allocation7 + $0x68] sm:$0xff] }
  0x56   :  { %778 = vmatprep.subr.bf16.mxu0 %v1048_v0  ;;  %v813_v47 = vpack.c.bf16 %v194_v46, %v193_v45  ;;  %v816_v50 = vpack.c.bf16 %v196_v49, %v195_v48  ;;  %v197_v51 = vld [vmem:[#allocation7 + $0x70] sm:$0xff]  ;;  %v198_v52 = vld [vmem:[#allocation7 + $0x78] sm:$0xff]  ;;  %v604_v55 = vld [vmem:[%s1215_s4] ss:$0 sm:$0xff] }
  0x57   :  { %v819_v54 = vpack.c.bf16 %v198_v52, %v197_v51  ;;  %v279_v59 = vld [vmem:[#allocation7 + $0x80] sm:$0xff]  ;;  %v280_v60 = vld [vmem:[#allocation7 + $0x88] sm:$0xff]  ;;  %v281_v62 = vld [vmem:[#allocation7 + $0x90] sm:$0xff] }
  0x58   :  { %805 = vmatpush3.bf16.msra.mxu1 %v804_v24  ;;  %v822_v61 = vpack.c.bf16 %v280_v60, %v279_v59  ;;  %v282_v63 = vld [vmem:[#allocation7 + $0x98] sm:$0xff]  ;;  %v283_v3 = vld [vmem:[#allocation7 + $0xa0] sm:$0xff]  ;;  %v284_v4 = vld [vmem:[#allocation7 + $0xa8] sm:$0xff] }
  0x59   :  { %780 = vmatpush1.bf16.msra.mxu0 %v779_v19  ;;  %806 = vmatprep.subr.bf16.mxu1 %v1048_v0  ;;  %v825_v2 = vpack.c.bf16 %v282_v63, %v281_v62  ;;  %v828_v5 = vpack.c.bf16 %v284_v4, %v283_v3  ;;  %v285_v6 = vld [vmem:[#allocation7 + $0xb0] sm:$0xff]  ;;  %v286_v7 = vld [vmem:[#allocation7 + $0xb8] sm:$0xff]  ;;  %v287_v9 = vld [vmem:[#allocation7 + $0xc0] sm:$0xff] }
  0x5a   :  { %781 = vmatprep.subr.bf16.mxu0 %v1048_v0  ;;  %v831_v8 = vpack.c.bf16 %v286_v7, %v285_v6  ;;  %v288_v10 = vld [vmem:[#allocation7 + $0xc8] sm:$0xff]  ;;  %v289_v12 = vld [vmem:[#allocation7 + $0xd0] sm:$0xff]  ;;  %v290_v13 = vld [vmem:[#allocation7 + $0xd8] sm:$0xff] }
  0x5b   :  { %v834_v11 = vpack.c.bf16 %v288_v10, %v287_v9  ;;  %v837_v14 = vpack.c.bf16 %v290_v13, %v289_v12  ;;  %v291_v15 = vld [vmem:[#allocation7 + $0xe0] sm:$0xff]  ;;  %v292_v16 = vld [vmem:[#allocation7 + $0xe8] sm:$0xff]  ;;  %v293_v18 = vld [vmem:[#allocation7 + $0xf0] sm:$0xff] }
  0x5c   :  { %808 = vmatpush3.bf16.msra.mxu1 %v807_v30  ;;  %v840_v17 = vpack.c.bf16 %v292_v16, %v291_v15  ;;  %v294_v19 = vld [vmem:[#allocation7 + $0xf8] sm:$0xff]  ;;  %v375_v21 = vld [vmem:[#allocation7 + $0x100] sm:$0xff]  ;;  %v376_v22 = vld [vmem:[#allocation7 + $0x108] sm:$0xff] }
  0x5d   :  { %783 = vmatpush1.bf16.msra.mxu0 %v782_v25  ;;  %809 = vmatprep.subr.bf16.mxu1 %v1048_v0  ;;  %v843_v20 = vpack.c.bf16 %v294_v19, %v293_v18  ;;  %v377_v23 = vld [vmem:[#allocation7 + $0x110] sm:$0xff]  ;;  %v846_v24 = vpack.c.bf16 %v376_v22, %v375_v21  ;;  %v378_v25 = vld [vmem:[#allocation7 + $0x118] sm:$0xff]  ;;  %v379_v27 = vld [vmem:[#allocation7 + $0x120] sm:$0xff] }
  0x5e   :  { %784 = vmatprep.subr.bf16.mxu0 %v1048_v0  ;;  %v849_v26 = vpack.c.bf16 %v378_v25, %v377_v23  ;;  %v380_v28 = vld [vmem:[#allocation7 + $0x128] sm:$0xff]  ;;  %v381_v30 = vld [vmem:[#allocation7 + $0x130] sm:$0xff]  ;;  %v383_v33 = vld [vmem:[#allocation7 + $0x140] sm:$0xff] }
  0x5f   :  { %v852_v29 = vpack.c.bf16 %v380_v28, %v379_v27  ;;  %v384_v34 = vld [vmem:[#allocation7 + $0x148] sm:$0xff]  ;;  %v385_v41 = vld [vmem:[#allocation7 + $0x150] sm:$0xff]  ;;  %v386_v42 = vld [vmem:[#allocation7 + $0x158] sm:$0xff] }
  0x60   :  { %811 = vmatpush3.bf16.msra.mxu1 %v810_v36  ;;  %v858_v35 = vpack.c.bf16 %v384_v34, %v383_v33  ;;  %v608_v36 = vld [vmem:[%s1215_s4 + $0x1] ss:$0 sm:$0xff]  ;;  %v388_v45 = vld [vmem:[#allocation7 + $0x168] sm:$0xff]  ;;  %v390_v48 = vld [vmem:[#allocation7 + $0x178] sm:$0xff] }
  0x61   :  { %786 = vmatpush1.bf16.msra.mxu0 %v785_v31  ;;  %812 = vmatprep.subr.bf16.mxu1 %v1048_v0  ;;  %v382_v31 = vld [vmem:[#allocation7 + $0x138] sm:$0xff]  ;;  %v470_v52 = vld [vmem:[#allocation8] sm:$0xff]  ;;  %v476_v60 = vld [vmem:[#allocation8 + $0x30] sm:$0xff] }
  0x62   :  { %787 = vmatprep.subr.bf16.mxu0 %v1048_v0  ;;  %v855_v32 = vpack.c.bf16 %v382_v31, %v381_v30  ;;  %v473_v51 = vld [vmem:[#allocation8 + $0x18] sm:$0xff]  ;;  %v474_v59 = vld [vmem:[#allocation8 + $0x20] sm:$0xff]  ;;  %v483_v3 = vld [vmem:[#allocation8 + $0x68] sm:$0xff] }
  0x63   :  { %v481_v62 = vld [vmem:[#allocation8 + $0x58] sm:$0xff]  ;;  %v875_v63 = vpack.c.bf16 %v476_v60, %v474_v59  ;;  %v482_v7 = vld [vmem:[#allocation8 + $0x60] sm:$0xff]  ;;  %v487_v9 = vld [vmem:[#allocation8 + $0x88] sm:$0xff] }
  0x64   :  { %814 = vmatpush3.bf16.msra.mxu1 %v813_v47  ;;  %v389_v47 = vld [vmem:[#allocation7 + $0x170] sm:$0xff]  ;;  %v485_v4 = vld [vmem:[#allocation8 + $0x78] sm:$0xff]  ;;  %v486_v13 = vld [vmem:[#allocation8 + $0x80] sm:$0xff] }
  0x65   :  { %789 = vmatpush1.bf16.msra.mxu0 %v788_v37  ;;  %815 = vmatprep.subr.bf16.mxu1 %v1048_v0  ;;  %v867_v49 = vpack.c.bf16 %v390_v48, %v389_v47  ;;  %v881_v6 = vpack.c.bf16 %v485_v4, %v483_v3  ;;  %v489_v10 = vld [vmem:[#allocation8 + $0x98] sm:$0xff]  ;;  %v610_v16 = vld [vmem:[%s1215_s4 + $0x2] ss:$0 sm:$0xff]  ;;  %v491_v21 = vld [vmem:[#allocation8 + $0xa8] sm:$0xff] }
  0x66   :  { %790 = vmatprep.subr.bf16.mxu0 %v1048_v0  ;;  %v885_v12 = vpack.c.bf16 %v489_v10, %v487_v9  ;;  %v493_v22 = vld [vmem:[#allocation8 + $0xb8] sm:$0xff]  ;;  %v492_v25 = vld [vmem:[#allocation8 + $0xb0] sm:$0xff]  ;;  %v495_v27 = vld [vmem:[#allocation8 + $0xc8] sm:$0xff] }
  0x67   :  { %v889_v23 = vpack.c.bf16 %v493_v22, %v491_v21  ;;  %v497_v28 = vld [vmem:[#allocation8 + $0xd8] sm:$0xff]  ;;  %v496_v31 = vld [vmem:[#allocation8 + $0xd0] sm:$0xff]  ;;  %v502_v47 = vld [vmem:[%s1216_s5] sm:$0x3] }
  0x68   :  { %817 = vmatpush3.bf16.msra.mxu1 %v816_v50  ;;  %v471_v50 = vld [vmem:[#allocation8 + $0x8] sm:$0xff]  ;;  %v893_v30 = vpack.c.bf16 %v497_v28, %v495_v27  ;;  %v501_v33 = vld [vmem:[#allocation8 + $0xf8] sm:$0xff] }
  0x69   :  { %792 = vmatpush1.bf16.msra.mxu0 %v791_v40  ;;  %818 = vmatprep.subr.bf16.mxu1 %v1048_v0 }
  0x6a   :  { %793 = vmatprep.subr.bf16.mxu0 %v1048_v0 }
  0x6c   :  { %820 = vmatpush3.bf16.msra.mxu1 %v819_v54  ;;  %v472_v54 = vld [vmem:[#allocation8 + $0x10] sm:$0xff] }
  0x6d   :  { %796 = vmatpush1.bf16.msk.msra.mxu0 %vm795_vm3, %v794_v43  ;;  %821 = vmatprep.subr.bf16.mxu1 %v1048_v0  ;;  %v861_v43 = vpack.c.bf16 %v386_v42, %v385_v41 }
  0x6e   :  { %845 = vmatprep.subr.bf16.mxu0 %v1048_v0 }
  0x70   :  { %177 = vmatmul.mubr.f32.vlgmr.msra.gmra.mrb[0].mxu0 %v77_v44  ;;  %v387_v44 = vld [vmem:[#allocation7 + $0x160] sm:$0xff] }
  0x71   :  { %766 = vmatprep.mubr.msk.f32.mxu0 %vm1050_vm4, %v1051_v53  ;;  %847 = vmatpush3.bf16.msra.mxu0 %v846_v24  ;;  %v864_v46 = vpack.c.bf16 %v388_v45, %v387_v44  ;;  %v490_v24 = vld [vmem:[#allocation8 + $0xa0] sm:$0xff]  ;;  %v504_v44 = vlaneseq }
  0x72   :  { %848 = vmatprep.subr.bf16.mxu0 %v1048_v0 }
  0x73   :  { %v505_v45 = vshrl.u32 %v504_v44, 7 }
  0x75   :  { %850 = vmatpush3.bf16.msra.mxu0 %v849_v26  ;;  %v891_v26 = vpack.c.bf16 %v492_v25, %v490_v24  ;;  %v510_v48 = vsub.s32 1, %v505_v45 }
  0x76   :  { %851 = vmatprep.subr.bf16.mxu0 %v1048_v0 }
  0x79   :  { %853 = vmatpush3.bf16.msra.mxu0 %v852_v29  ;;  %v494_v29 = vld [vmem:[#allocation8 + $0xc0] sm:$0xff] }
  0x7a   :  { %854 = vmatprep.subr.bf16.mxu0 %v1048_v0  ;;  %v895_v34 = vpack.c.bf16 %v496_v31, %v494_v29 }
  0x7d   :  { %856 = vmatpush3.bf16.msra.mxu0 %v855_v32  ;;  %v499_v32 = vld [vmem:[#allocation8 + $0xe8] sm:$0xff] }
  0x7e   :  { %857 = vmatprep.subr.bf16.mxu0 %v1048_v0 }
  0x81   :  { %859 = vmatpush3.bf16.msra.mxu0 %v858_v35  ;;  %v897_v35 = vpack.c.bf16 %v501_v33, %v499_v32 }
  0x82   :  { %860 = vmatprep.subr.bf16.mxu0 %v1048_v0 }
  0x85   :  { %862 = vmatpush3.bf16.msra.mxu0 %v861_v43 }
  0x86   :  { %863 = vmatprep.subr.bf16.mxu0 %v1048_v0 }
  0x89   :  { %865 = vmatpush3.bf16.msra.mxu0 %v864_v46  ;;  %v506_v46 = vsub.s32 0, %v505_v45 }
  0x8a   :  { %866 = vmatprep.subr.bf16.mxu0 %v1048_v0 }
  0x8d   :  { %868 = vmatpush3.bf16.msra.mxu0 %v867_v49  ;;  %v507_v49 = vrot.slane %v502_v47, %v506_v46 }
 0x143   :  { %v178_v56 = vpop.f32.mrb[0].mxu0 }
 0x144   :  { %v179_v57 = vadd.f32 %v604_v55, %v178_v56  ;;  %v180_v58 = vpop.f32.mrb[1].mxu0  ;;  %v475_v55 = vld [vmem:[#allocation8 + $0x28] sm:$0xff]  ;;  %v477_v56 = vld [vmem:[#allocation8 + $0x38] sm:$0xff] }
 0x145   :  { %v873_v58 = vpack.c.bf16 %v477_v56, %v475_v55 }
 0x146   :  { %914 = vtanh.f32 %v179_v57  ;;  %v871_v57 = vpack.c.bf16 %v472_v54, %v470_v52 }
 0x150   :  { %v915_v1 = vpop.eup %914 }
 0x151   :  { %697 = vmatmul.mubr.f32.vlgmr.msra.gmra.mrb[0].mxu1 %v915_v1 }
 0x152   :  { %823 = vmatpush3.bf16.msra.mxu1 %v822_v61  ;;  %731 = vmatprep.mubr.msk.f32.mxu1 %vm1050_vm4, %v1051_v53  ;;  %v479_v61 = vld [vmem:[#allocation8 + $0x48] sm:$0xff] }
 0x153   :  { %824 = vmatprep.subr.bf16.mxu1 %v1048_v0  ;;  %v877_v1 = vpack.c.bf16 %v481_v62, %v479_v61 }
 0x156   :  { %826 = vmatpush3.bf16.msra.mxu1 %v825_v2  ;;  %v480_v2 = vld [vmem:[#allocation8 + $0x50] sm:$0xff] }
 0x157   :  { %827 = vmatprep.subr.bf16.mxu1 %v1048_v0 }
 0x15a   :  { %829 = vmatpush3.bf16.msra.mxu1 %v828_v5 }
 0x15b   :  { %830 = vmatprep.subr.bf16.mxu1 %v1048_v0 }
 0x15e   :  { %832 = vmatpush3.bf16.msra.mxu1 %v831_v8  ;;  %v484_v8 = vld [vmem:[#allocation8 + $0x70] sm:$0xff] }
 0x15f   :  { %833 = vmatprep.subr.bf16.mxu1 %v1048_v0 }
 0x162   :  { %835 = vmatpush3.bf16.msra.mxu1 %v834_v11  ;;  %v883_v11 = vpack.c.bf16 %v484_v8, %v482_v7 }
 0x163   :  { %836 = vmatprep.subr.bf16.mxu1 %v1048_v0 }
 0x166   :  { %838 = vmatpush3.bf16.msra.mxu1 %v837_v14  ;;  %v488_v14 = vld [vmem:[#allocation8 + $0x90] sm:$0xff] }
 0x167   :  { %839 = vmatprep.subr.bf16.mxu1 %v1048_v0  ;;  %v887_v15 = vpack.c.bf16 %v488_v14, %v486_v13 }
 0x16a   :  { %841 = vmatpush3.bf16.msra.mxu1 %v840_v17 }
 0x16b   :  { %842 = vmatprep.subr.bf16.mxu1 %v1048_v0  ;;  %v478_v0 = vld [vmem:[#allocation8 + $0x40] sm:$0xff] }
 0x16c   :  { %v879_v5 = vpack.c.bf16 %v480_v2, %v478_v0 }
 0x16e   :  { %844 = vmatpush3.bf16.msra.mxu1 %v843_v20 }
 0x224   :  { %v273_v37 = vpop.f32.mrb[0].mxu1 }
 0x225   :  { %v274_v38 = vadd.f32 %v608_v36, %v273_v37  ;;  %v698_v39 = vpop.f32.mrb[1].mxu1  ;;  %v498_v36 = vld [vmem:[#allocation8 + $0xe0] sm:$0xff]  ;;  %v500_v37 = vld [vmem:[#allocation8 + $0xf0] sm:$0xff] }
 0x226   :  { %v612_v39 = vld [vmem:[%s1215_s4 + $0x3] ss:$0 sm:$0xff]  ;;  %s1010_s4 = scalar_lea.vmem %s594_s9, 256 }
 0x227   :  { %916 = vtanh.f32 %v274_v38  ;;  %v899_v38 = vpack.c.bf16 %v500_v37, %v498_v36  ;;  %p1011_p4 = scmp.ne.s32.totalorder %s594_s9, %s1010_s4  ;;  %p1016_p6 = scmp.lt.s32.totalorder %s1010_s4, %s1010_s4 }
 0x229   :  { %p1017_p7 = por %p1016_p6, %p1015_p5 }
 0x22b   :  { %p1018_p8 = pnand %p1017_p7, %p1011_p4 }
 0x231   :  { %v917_v40 = vpop.eup %916 }
 0x232   :  { %732 = vmatmul.mubr.f32.vlgmr.msra.gmra.mrb[2].mxu1 %v917_v40 }
 0x233   :  { %578 = vmatprep.mubr.f32.mxu1 %v1051_v53  ;;  %v869_v53 = vpack.c.bf16 %v473_v51, %v471_v50  ;;  %v511_v50 = vrot.slane %v502_v47, %v510_v48 }
 0x235   :  { %870 = vmatprep.subr.bf16.mxu1 %v869_v53 }
 0x236   :  { %872 = vmatpush1.bf16.msra.mxu1 %v871_v57 }
 0x237   :  { %874 = vmatprep.subr.bf16.mxu1 %v873_v58 }
 0x23a   :  { %876 = vmatpush1.bf16.msra.mxu1 %v875_v63 }
 0x23b   :  { %878 = vmatprep.subr.bf16.mxu1 %v877_v1 }
 0x23e   :  { %880 = vmatpush1.bf16.msra.mxu1 %v879_v5 }
 0x23f   :  { %882 = vmatprep.subr.bf16.mxu1 %v881_v6 }
 0x242   :  { %884 = vmatpush1.bf16.msra.mxu1 %v883_v11 }
 0x243   :  { %886 = vmatprep.subr.bf16.mxu1 %v885_v12 }
 0x246   :  { %888 = vmatpush1.bf16.msra.mxu1 %v887_v15 }
 0x247   :  { %890 = vmatprep.subr.bf16.mxu1 %v889_v23 }
 0x24a   :  { %892 = vmatpush1.bf16.msra.mxu1 %v891_v26 }
 0x24b   :  { %894 = vmatprep.subr.bf16.mxu1 %v893_v30 }
 0x24e   :  { %896 = vmatpush1.bf16.msra.mxu1 %v895_v34 }
 0x24f   :  { %898 = vmatprep.subr.bf16.mxu1 %v897_v35 }
 0x252   :  { %900 = vmatpush1.bf16.msra.mxu1 %v899_v38 }
 0x305   :  { %v369_v17 = vpop.f32.mrb[2].mxu1 }
 0x306   :  { %v370_v18 = vadd.f32 %v610_v16, %v369_v17  ;;  %v733_v19 = vpop.f32.mrb[3].mxu1 }
 0x308   :  { %918 = vtanh.f32 %v370_v18 }
 0x312   :  { %v919_v20 = vpop.eup %918 }
 0x313   :  { %767 = vmatmul.mubr.f32.vlgmr.msra.gmra.mrb[2].mxu0 %v919_v20 }
 0x3e6   :  { %v465_v40 = vpop.f32.mrb[2].mxu0 }
 0x3e7   :  { %v466_v41 = vadd.f32 %v612_v39, %v465_v40  ;;  %v768_v42 = vpop.f32.mrb[3].mxu0 }
 0x3e9   :  { %920 = vtanh.f32 %v466_v41 }
 0x3f3   :  { %v921_v43 = vpop.eup %920 }
 0x3f4   :  { %579 = vmatmul.mubr.f32.vlgmr.msra.gmra.mrb[4].mxu1 %v921_v43 }
 0x4c7   :  { %v580_v51 = vpop.f32.mrb[4].mxu1 }
 0x4c8   :  { %v581_v52 = vadd.f32 %v580_v51, %v507_v49  ;;  %v582_v53 = vpop.f32.mrb[5].mxu1 }
 0x4c9   :  { %v583_v54 = vadd.f32 %v582_v53, %v511_v50 }
 0x4ca   :  { %585 = vst [vmem:[#allocation10] sm:$0xff] %v581_v52 }
 0x4cb   :  { %586 = vst.msk [vmem:[#allocation10 + $0x8] sm:$0xff] %vm104_vm0, %v583_v54 }
 0x4cc   :  { %1021 = shalt.err (!%p1018_p8)
}
 0x4cd   :  { %s1022_s10 = scalar_lea.hbm %s1217_s6, 256 }
 0x4ce   :  { %p1023_p9 = scmp.ne.s32.totalorder %s1217_s6, %s1022_s10  ;;  %p1026_p10 = scmp.lt.u32.totalorder %s1022_s10, %s1217_s6 }
 0x4d0   :  { %p1028_p11 = pnand %p1026_p10, %p1023_p9 }
 0x4d2   :  { %1031 = shalt.err (!%p1028_p11)
}
 0x4d3   :  { %596 = dma.vmem_to_hbm [thread:$0]  %s594_s9, 256, %s1217_s6, [#allocation4]  }
 0x4d4   :  { %1038 = dma.done.wait [#allocation4], 256  }
 0x4d5   :  { %1039 = vsyncadd [#allocation4], 4294967040 }
 0x4d6   :  { %600 = vsyncpa [#allocation3], 1 }
 0x4d7   :  { %601 = vsyncpa [#allocation6], 1 }
 0x4d8   :  { %602 = vsyncpa [#allocation9], 1 }
 0x4d9   :  { %603 = vsyncpa [#allocation4], 1 }

</bundles_post_ra>
